<compile_context>
chip_gen: v7x
topology: tpu7x:2x2x1
jax: 0.10.0
libtpu: 0.0.40
codegen_flags: <defaults>
</compile_context>

<pallas_src>
import functools
import numpy as np
import jax
import jax.numpy as jnp
from jax import lax
from jax.experimental import pallas as pl
from jax.experimental.pallas import tpu as pltpu


# ----------------------------------------------------------------------------
# generation-aware VMEM sizing
# ----------------------------------------------------------------------------
def _vmem_params():
    """(tile_budget_bytes, vmem_limit_bytes).

    v5e / v5p / v6e have 128 MiB physical VMEM -> larger scoped limit & tiles.
    v7x (64 MiB physical) or anything unrecognised -> conservative defaults.
    """
    try:
        kind = jax.devices()[0].device_kind.lower()
    except Exception:
        kind = ""
    if ("v5" in kind) or ("v6" in kind):
        return 40 * 1024 * 1024, 64 * 1024 * 1024
    return 18 * 1024 * 1024, 32 * 1024 * 1024


# ----------------------------------------------------------------------------
# Pallas kernel 1: fused prototype sums, native [B,C,HW] layout (no transpose)
#   sum_a[s, c] = sum_{b,p} valid[b,s,p] / sigma[b,c,p]
#   sum_b[s, c] = sum_{b,p} valid[b,s,p] * mu[b,c,p] / sigma[b,c,p]
# ----------------------------------------------------------------------------
def proto_sums_kernel(valid_ref, mu_ref, sigma_ref, sum_a_ref, sum_b_ref):
    # grid = (B, n_pixel_tiles); the pixel-tile axis is the reduction axis.
    @pl.when(pl.program_id(1) == 0)
    def _():
        sum_a_ref[...] = jnp.zeros_like(sum_a_ref)
        sum_b_ref[...] = jnp.zeros_like(sum_b_ref)

    v = valid_ref[0].astype(jnp.float32)          # (S, tp): bf16 DMA, f32 MXU
    inv = 1.0 / sigma_ref[0]                      # (C, tp): VPU idle -> free
    nt = (((1,), (1,)), ((), ()))                 # contract over the pixel axis
    sum_a_ref[0] += lax.dot_general(v, inv, nt,
                                    preferred_element_type=jnp.float32)
    sum_b_ref[0] += lax.dot_general(v, mu_ref[0] * inv, nt,
                                    preferred_element_type=jnp.float32)


def proto_sums(valid_bsp, mu_bcp, sigma_bcp, *, budget_bytes, vmem_limit_bytes):
    """valid: [B,S,HW], mu/sigma: [B,C,HW] (native layout) -> two [S,C] sums."""
    B, S, HW = valid_bsp.shape
    C = mu_bcp.shape[1]

    # Per-pixel VMEM bytes: double-buffered inputs (bf16 valid + 2 f32 feature
    # arrays) + in-kernel temporaries (f32 valid, 1/sigma, mu/sigma).
    per_px = 2 * (2 * S + 8 * C) + (4 * S + 8 * C)
    tp = max(512, (budget_bytes // per_px) // 128 * 128)
    tp = max(128, min(tp, pl.cdiv(HW, 128) * 128))
    nbp = pl.cdiv(HW, tp)
    hw_pad = nbp * tp
    if hw_pad != HW:
        p = hw_pad - HW
        valid_bsp = jnp.pad(valid_bsp, ((0, 0), (0, 0), (0, p)))
        mu_bcp = jnp.pad(mu_bcp, ((0, 0), (0, 0), (0, p)))
        sigma_bcp = jnp.pad(sigma_bcp, ((0, 0), (0, 0), (0, p)),
                            constant_values=1.0)          # avoid 1/0 in padding

    sum_a, sum_b = pl.pallas_call(
        proto_sums_kernel,
        out_shape=(jax.ShapeDtypeStruct((B, S, C), jnp.float32),
                   jax.ShapeDtypeStruct((B, S, C), jnp.float32)),
        grid_spec=pltpu.PrefetchScalarGridSpec(
            num_scalar_prefetch=0, grid=(B, nbp),
            in_specs=[pl.BlockSpec((1, S, tp), lambda b, k: (b, 0, k)),
                      pl.BlockSpec((1, C, tp), lambda b, k: (b, 0, k)),
                      pl.BlockSpec((1, C, tp), lambda b, k: (b, 0, k))],
            out_specs=[pl.BlockSpec((1, S, C), lambda b, k: (b, 0, 0)),
                       pl.BlockSpec((1, S, C), lambda b, k: (b, 0, 0))]),
        compiler_params=pltpu.CompilerParams(
            dimension_semantics=("parallel", "arbitrary"),
            vmem_limit_bytes=vmem_limit_bytes),
    )(valid_bsp.astype(jnp.bfloat16), mu_bcp, sigma_bcp)
    # tiny per-batch partials; the parallel B axis shards across v7x cores
    return sum_a.sum(axis=0), sum_b.sum(axis=0)


# ----------------------------------------------------------------------------
# Pallas kernel 2: batched mutual-likelihood-score logits + CE(target=0)
#   grid = (class, query-tile); candidate slot 0 along K is the positive.
# ----------------------------------------------------------------------------
def mls_ce_kernel(a_mu_ref, a_sig_ref, c_mu_ref, c_sig_ref, g_mu_ref,
                  loss_ref, *, temp, has_gen):
    a_mu = a_mu_ref[0]                               # (tq, C)
    a_sig = a_sig_ref[0]                             # (tq, C)
    c_mu = c_mu_ref[0]                               # (tq, K, C)
    c_sig = c_sig_ref[0]                             # (tq, K, C)
    C = a_mu.shape[-1]
    scale = -0.5 / (C * temp)                        # fold mean, -0.5 and 1/temp

    eps2 = 1e-24                                     # F.normalize eps=1e-12, squared
    a_n = a_mu * lax.rsqrt(jnp.maximum(
        jnp.sum(a_mu * a_mu, axis=-1, keepdims=True), eps2))
    c_n = c_mu * lax.rsqrt(jnp.maximum(
        jnp.sum(c_mu * c_mu, axis=-1, keepdims=True), eps2))

    down = a_sig[:, None, :] + c_sig                 # (tq, K, C)
    diff = a_n[:, None, :] - c_n
    # TODO(synk): on v6e/v7x the log/reciprocal could run in bf16 (EUP is the
    # saturating unit); kept f32 so the loss tracks the reference closely.
    core = jnp.sum(diff * diff * pl.reciprocal(down, approx=True)
                   + jnp.log(down), axis=-1)         # (tq, K)
    z_main = core * scale
    z_max = jnp.max(z_main, axis=-1, keepdims=True)  # (tq, 1)

    if has_gen:
        g_mu = g_mu_ref[0]                           # (G, C)
        g_n = g_mu * lax.rsqrt(jnp.maximum(
            jnp.sum(g_mu * g_mu, axis=-1, keepdims=True), eps2))
        # generalized candidates have sigma == 0 -> down == anchor_sigma.
        inv_asig = 1.0 / a_sig                                       # (tq, C)
        sum_log_asig = jnp.sum(jnp.log(a_sig), axis=-1, keepdims=True)
        # sum_c (a_n - g_n)^2 * inv_asig = t1 - 2*t2 + t3, on the idle MXU
        nt = (((1,), (1,)), ((), ()))
        t1 = jnp.sum(a_n * a_n * inv_asig, axis=-1, keepdims=True)   # (tq, 1)
        t2 = lax.dot_general(a_n * inv_asig, g_n, nt,
                             preferred_element_type=jnp.float32)     # (tq, G)
        t3 = lax.dot_general(inv_asig, g_n * g_n, nt,
                             preferred_element_type=jnp.float32)     # (tq, G)
        z_gen = (t1 - 2.0 * t2 + t3 + sum_log_asig) * scale          # (tq, G)
        z_max = jnp.maximum(z_max, jnp.max(z_gen, axis=-1, keepdims=True))
        sum_exp = (jnp.sum(jnp.exp(z_main - z_max), axis=-1, keepdims=True)
                   + jnp.sum(jnp.exp(z_gen - z_max), axis=-1, keepdims=True))
    else:
        sum_exp = jnp.sum(jnp.exp(z_main - z_max), axis=-1, keepdims=True)

    # cross entropy with target class 0 (candidate slot 0 is the positive);
    # direct (tq, 1) column write, host reshapes.
    loss_ref[0] = jnp.log(sum_exp) + z_max - z_main[:, 0:1]


def mls_cross_entropy_batched(anchor_mu, anchor_sigma, cand_mu, cand_sigma,
                              gen_mu, temp):
    """anchor_*: [Vh,Q,C], cand_*: [Vh,Q,K,C], gen_mu: [Vh,G,C] -> loss [Vh,Q]."""
    Vh, Q, C = anchor_mu.shape
    K = cand_mu.shape[2]
    G = gen_mu.shape[1]
    has_gen = G > 0
    if not has_gen:                                  # keep a non-empty block
        gen_mu = jnp.zeros((Vh, 1, C), jnp.float32)
        G = 1

    budget, vmem_limit = _vmem_params()
    # per-query VMEM: double-buffered cand mu/sigma tiles + ~4 live (K,C) temps
    per_q = (2 * 2 + 4) * K * C * 4 + 16 * C
    tq = max(8, min(Q, (budget // max(per_q, 1)) // 8 * 8))
    if tq >= Q:
        tq = Q
    q_pad = pl.cdiv(Q, tq) * tq
    if q_pad != Q:                                   # pad queries, slice after
        pq = q_pad - Q
        anchor_mu = jnp.pad(anchor_mu, ((0, 0), (0, pq), (0, 0)), mode="edge")
        anchor_sigma = jnp.pad(anchor_sigma, ((0, 0), (0, pq), (0, 0)),
                               mode="edge")
        cand_mu = jnp.pad(cand_mu, ((0, 0), (0, pq), (0, 0), (0, 0)),
                          mode="edge")
        cand_sigma = jnp.pad(cand_sigma, ((0, 0), (0, pq), (0, 0), (0, 0)),
                             mode="edge")

    kernel = functools.partial(mls_ce_kernel, temp=float(temp), has_gen=has_gen)
    out = pl.pallas_call(
        kernel,
        out_shape=jax.ShapeDtypeStruct((Vh, q_pad, 1), jnp.float32),
        grid_spec=pltpu.PrefetchScalarGridSpec(
            num_scalar_prefetch=0, grid=(Vh, q_pad // tq),
            in_specs=[pl.BlockSpec((1, tq, C), lambda i, q: (i, q, 0)),
                      pl.BlockSpec((1, tq, C), lambda i, q: (i, q, 0)),
                      pl.BlockSpec((1, tq, K, C), lambda i, q: (i, q, 0, 0)),
                      pl.BlockSpec((1, tq, K, C), lambda i, q: (i, q, 0, 0)),
                      pl.BlockSpec((1, G, C), lambda i, q: (i, 0, 0))],
            out_specs=pl.BlockSpec((1, tq, 1), lambda i, q: (i, q, 0))),
        compiler_params=pltpu.CompilerParams(
            dimension_semantics=("parallel", "parallel"),
            vmem_limit_bytes=vmem_limit),
    )(anchor_mu, anchor_sigma, cand_mu, cand_sigma, gen_mu)
    return out[:, :Q, 0]                             # [Vh, Q]


# ----------------------------------------------------------------------------
# host-side glue reproducing the reference control flow
# ----------------------------------------------------------------------------
def _mls_np(mu0, mu1, s0, s1):
    mu0 = mu0 / np.maximum(np.linalg.norm(mu0, axis=-1, keepdims=True), 1e-12)
    mu1 = mu1 / np.maximum(np.linalg.norm(mu1, axis=-1, keepdims=True), 1e-12)
    up = (mu0 - mu1) ** 2
    down = s0 + s1
    return -0.5 * (up / down + np.log(down)).mean(-1)


def grcl_loss_forward(cfg, mu, sigma, label, mask, prob,
                      mmt_prototype_mu, mmt_prototype_sigma, np_rng):
    B, C, H, W = mu.shape
    S = label.shape[1]
    HW = H * W

    valid_pixel_all = label * mask                               # [B,S,H,W]
    # concat_all_gather == identity (single device)

    budget, vmem_limit = _vmem_params()
    # prototype Gaussian-product sums straight off the native layout (reshape
    # only; no device transpose feeding the kernel)
    sum_a, sum_b = proto_sums(valid_pixel_all.reshape(B, S, HW),
                              mu.reshape(B, C, HW),
                              sigma.reshape(B, C, HW),
                              budget_bytes=budget,
                              vmem_limit_bytes=vmem_limit)
    sum_a = np.asarray(sum_a)
    sum_b = np.asarray(sum_b)
    with np.errstate(divide="ignore", invalid="ignore"):
        proto_sigma_all = 1.0 / sum_a                            # [S, C]
        proto_mu_all = sum_b / sum_a      # rows of zero-valid classes are
                                          # NaN/inf and skipped below (as ref)

    # host-side pixel-major copies only for the data-dependent boolean gathers
    mu_np = np.asarray(mu).transpose(0, 2, 3, 1).reshape(-1, C)
    sigma_np = np.asarray(sigma).transpose(0, 2, 3, 1).reshape(-1, C)
    valid_np = np.asarray(valid_pixel_all).transpose(1, 0, 2, 3).reshape(S, -1)
    prob_np = np.asarray(prob).transpose(1, 0, 2, 3).reshape(S, -1)
    mmt_mu = np.asarray(mmt_prototype_mu).copy()
    mmt_sigma = np.asarray(mmt_prototype_sigma).copy()

    mu_all_list, sigma_all_list = [], []
    mu_hard_list, sigma_hard_list = [], []
    num_list, proto_mu_list, proto_sigma_list, valid_id = [], [], [], []

    for i in range(S):
        vp = valid_np[i]
        valid_id.append(i)
        if vp.sum() == 0:
            valid_id.pop()
            continue
        hard = (prob_np[i] < cfg["strong_threshold"]) & (vp > 0)

        # NOTE: reference's `.sum == 0` check is always False (missing parens),
        # so the momentum-update branch is always taken; reproduced here.
        p_sigma = proto_sigma_all[i:i + 1]                        # [1, C]
        p_mu = proto_mu_all[i:i + 1]
        new_sigma = 1.0 / (1.0 / p_sigma + 1.0 / mmt_sigma[i:i + 1])
        new_mu = new_sigma * (mmt_mu[i:i + 1] / mmt_sigma[i:i + 1]
                              + p_mu / p_sigma)
        mmt_mu[i] = new_mu[0]
        mmt_sigma[i] = new_sigma[0]
        proto_mu_list.append(new_mu)
        proto_sigma_list.append(new_sigma)

        sel = vp > 0
        mu_all_list.append(mu_np[sel])
        sigma_all_list.append(sigma_np[sel])
        mu_hard_list.append(mu_np[hard])
        sigma_hard_list.append(sigma_np[hard])
        num_list.append(int(vp.sum()))

    if len(num_list) <= 1 and len(num_list) >= 13:   # unreachable (as in ref)
        return jnp.float32(0.0), mmt_mu, mmt_sigma

    proto_mu = np.concatenate(proto_mu_list, axis=0)              # [V, C]
    proto_sigma = np.concatenate(proto_sigma_list, axis=0)
    V = len(num_list)
    Q, N = cfg["num_queries"], cfg["num_negatives"]

    # ---- build per-class anchor / candidate / generalized stacks (host) ----
    anc_mu_b, anc_sig_b, cand_mu_b, cand_sig_b, gen_mu_b = [], [], [], [], []
    for i in range(V):
        if len(mu_hard_list[i]) == 0:
            continue
        sample_idx = np_rng.integers(0, len(mu_hard_list[i]), size=Q)
        anchor_mu = mu_hard_list[i][sample_idx]                   # [Q, C]
        anchor_sigma = sigma_hard_list[i][sample_idx]

        id_mask = np.concatenate([np.arange(i, V), np.arange(0, i)])
        proto_sim = _mls_np(proto_mu[id_mask[:1]], proto_mu[id_mask[1:]],
                            proto_sigma[id_mask[:1]], proto_sigma[id_mask[1:]])
        z = proto_sim / cfg["temp"]
        z = z - z.max()
        proto_prob = np.exp(z) / np.exp(z).sum()

        samp_class = np_rng.choice(V - 1, size=(Q, N), p=proto_prob)
        samp_num = np.stack([(samp_class == c).sum(1)
                             for c in range(V - 1)], axis=1)
        negative_num_list = num_list[i + 1:] + num_list[:i]
        negative_index = []
        for qi in range(samp_num.shape[0]):
            for j in range(samp_num.shape[1]):
                lo = sum(negative_num_list[:j])
                hi = sum(negative_num_list[:j + 1])
                negative_index += np_rng.integers(
                    lo, hi, size=int(samp_num[qi, j])).tolist()

        negative_mu_all = np.concatenate(mu_all_list[i + 1:] + mu_all_list[:i])
        negative_sigma_all = np.concatenate(
            sigma_all_list[i + 1:] + sigma_all_list[:i])
        negative_mu = negative_mu_all[negative_index].reshape(Q, N, C)
        negative_sigma = negative_sigma_all[negative_index].reshape(Q, N, C)

        positive_mu = np.broadcast_to(proto_mu[i][None, None, :], (Q, 1, C))
        positive_sigma = np.broadcast_to(proto_sigma[i][None, None, :],
                                         (Q, 1, C))
        cand_mu_b.append(np.concatenate([positive_mu, negative_mu], axis=1))
        cand_sig_b.append(np.concatenate([positive_sigma, negative_sigma],
                                         axis=1))
        anc_mu_b.append(anchor_mu)
        anc_sig_b.append(anchor_sigma)

        negative_id = sorted(set(range(S)) - {valid_id[i]})
        # TODO(synk): reference's self.reparameterize is undefined; implemented
        # as standard gaussian reparameterization around momentum prototypes.
        gen_list = []
        for _ in range(cfg["num_generalized"]):
            eps = np_rng.standard_normal((len(negative_id), C))
            gen_list.append(mmt_mu[negative_id]
                            + cfg["generalized_radius"]
                            * np.sqrt(mmt_sigma[negative_id]) * eps)
        if gen_list:
            gen_mu_b.append(np.concatenate(gen_list, axis=0))     # [G, C]
        else:
            gen_mu_b.append(np.zeros((0, C), np.float32))

    Vh = len(anc_mu_b)
    if Vh == 0:
        return jnp.float32(0.0), mmt_mu, mmt_sigma

    per_q = mls_cross_entropy_batched(
        jnp.asarray(np.stack(anc_mu_b), jnp.float32),
        jnp.asarray(np.stack(anc_sig_b), jnp.float32),
        jnp.asarray(np.stack(cand_mu_b), jnp.float32),
        jnp.asarray(np.stack(cand_sig_b), jnp.float32),
        jnp.asarray(np.stack(gen_mu_b), jnp.float32),
        cfg["temp"])                                              # [Vh, Q]
    # each class contributes its mean-over-queries CE; divide by V valid classes
    prcl_loss = jnp.sum(per_q) / (Q * V)
    return prcl_loss, mmt_mu, mmt_sigma


# ----------------------------------------------------------------------------
if __name__ == "__main__":
    B, C, H, W, S = 2, 32, 16, 16, 4
    cfg = dict(num_queries=8, num_negatives=16, num_positives=1,
               num_generalized=2, generalized_radius=1.0,
               temp=0.5, strong_threshold=0.97)

    key = jax.random.PRNGKey(0)
    ks = jax.random.split(key, 8)
    mu = jax.random.normal(ks[0], (B, C, H, W), jnp.float32)
    sigma = jax.random.uniform(ks[1], (B, C, H, W), jnp.float32, 0.5, 1.5)
    cls = jax.random.randint(ks[2], (B, H, W), 0, S)
    label = jax.nn.one_hot(cls, S, axis=1).astype(jnp.float32)     # [B,S,H,W]
    mask = (jax.random.uniform(ks[3], (B, 1, H, W)) > 0.2).astype(jnp.float32)
    prob = jax.nn.softmax(jax.random.normal(ks[4], (B, S, H, W)), axis=1)
    # deterministic "parameter"/state init (momentum prototypes)
    mmt_prototype_mu = jax.random.normal(ks[5], (S, C), jnp.float32) * 0.1
    mmt_prototype_sigma = jnp.ones((S, C), jnp.float32)

    np_rng = np.random.default_rng(0)
    loss, mmt_mu_new, mmt_sigma_new = grcl_loss_forward(
        cfg, mu, sigma, label, mask, prob,
        mmt_prototype_mu, mmt_prototype_sigma, np_rng)
    loss = jax.block_until_ready(loss)
    assert np.isfinite(np.asarray(loss)), "non-finite loss"
    print("KERNEL_OK")
</pallas_src>

<mosaic_0001>
module attributes {stable_mosaic.version = 11 : i64} {
  func.func @proto_sums_kernel(%arg0: i32, %arg1: i32, %arg2: memref<1x4x256xbf16, #tpu.memory_space<vmem>>, %arg3: memref<1x32x256xf32, #tpu.memory_space<vmem>>, %arg4: memref<1x32x256xf32, #tpu.memory_space<vmem>>, %arg5: memref<1x4x32xf32, #tpu.memory_space<vmem>>, %arg6: memref<1x4x32xf32, #tpu.memory_space<vmem>>) attributes {dimension_semantics = [#tpu.dimension_semantics<parallel>, #tpu.dimension_semantics<arbitrary>], iteration_bounds = array<i64: 2, 1>, scalar_prefetch = 0 : i64, scratch_operands = 0 : i64, tpu.core_type = #tpu.core_type<tc>, window_params = [{transform_indices = @transform_0, window_bounds = array<i64: 1, 4, 256>}, {transform_indices = @transform_1, window_bounds = array<i64: 1, 32, 256>}, {transform_indices = @transform_2, window_bounds = array<i64: 1, 32, 256>}, {transform_indices = @transform_3, window_bounds = array<i64: 1, 4, 32>}, {transform_indices = @transform_4, window_bounds = array<i64: 1, 4, 32>}]} {
    %c0_i32 = arith.constant 0 : i32
    %0 = arith.cmpi eq, %arg1, %c0_i32 : i32
    %1 = arith.extui %0 : i1 to i32
    %c0_i32_0 = arith.constant 0 : i32
    %2 = arith.cmpi ne, %1, %c0_i32_0 : i32
    scf.if %2 {
      %cst_23 = arith.constant 0.000000e+00 : f32
      %27 = vector.broadcast %cst_23 : f32 to vector<1x4x32xf32>
      %c0_24 = arith.constant 0 : index
      %c0_25 = arith.constant 0 : index
      %c0_26 = arith.constant 0 : index
      %28 = vector.load %arg5[%c0_24, %c0_25, %c0_26] : memref<1x4x32xf32, #tpu.memory_space<vmem>>, vector<1x4x32xf32>
      tpu.vector_store %arg5[%c0_24, %c0_25, %c0_26], %27 {strides = array<i32>} : memref<1x4x32xf32, #tpu.memory_space<vmem>>, vector<1x4x32xf32>,
      %cst_27 = arith.constant 0.000000e+00 : f32
      %29 = vector.broadcast %cst_27 : f32 to vector<1x4x32xf32>
      %c0_28 = arith.constant 0 : index
      %c0_29 = arith.constant 0 : index
      %c0_30 = arith.constant 0 : index
      %30 = vector.load %arg6[%c0_28, %c0_29, %c0_30] : memref<1x4x32xf32, #tpu.memory_space<vmem>>, vector<1x4x32xf32>
      tpu.vector_store %arg6[%c0_28, %c0_29, %c0_30], %29 {strides = array<i32>} : memref<1x4x32xf32, #tpu.memory_space<vmem>>, vector<1x4x32xf32>,
    } else {
    }
    %c0 = arith.constant 0 : index
    %c0_1 = arith.constant 0 : index
    %c0_2 = arith.constant 0 : index
    %3 = vector.load %arg2[%c0, %c0_1, %c0_2] : memref<1x4x256xbf16, #tpu.memory_space<vmem>>, vector<1x4x256xbf16>
    %4 = vector.shape_cast %3 : vector<1x4x256xbf16> to vector<4x256xbf16>
    %5 = arith.extf %4 : vector<4x256xbf16> to vector<4x256xf32>
    %c0_3 = arith.constant 0 : index
    %c0_4 = arith.constant 0 : index
    %c0_5 = arith.constant 0 : index
    %6 = vector.load %arg4[%c0_3, %c0_4, %c0_5] : memref<1x32x256xf32, #tpu.memory_space<vmem>>, vector<1x32x256xf32>
    %7 = vector.shape_cast %6 : vector<1x32x256xf32> to vector<32x256xf32>
    %cst = arith.constant 1.000000e+00 : f32
    %8 = vector.broadcast %cst : f32 to vector<32x256xf32>
    %9 = arith.divf %8, %7 : vector<32x256xf32>
    %c0_6 = arith.constant 0 : index
    %c0_7 = arith.constant 0 : index
    %c0_8 = arith.constant 0 : index
    %10 = vector.load %arg5[%c0_6, %c0_7, %c0_8] : memref<1x4x32xf32, #tpu.memory_space<vmem>>, vector<1x4x32xf32>
    %11 = vector.shape_cast %10 : vector<1x4x32xf32> to vector<4x32xf32>
    %cst_9 = arith.constant dense<0.000000e+00> : vector<4x32xf32>
    %12 = tpu.matmul %5, %9, %cst_9 {dimension_numbers = #tpu.dot_dimension_numbers<[1], [1], [0], [0], [0, 0, 1, 0], [], []>} : vector<4x256xf32>, vector<32x256xf32>, vector<4x32xf32> -> vector<4x32xf32>
    %13 = arith.addf %11, %12 : vector<4x32xf32>
    %c0_10 = arith.constant 0 : index
    %c0_11 = arith.constant 0 : index
    %c0_12 = arith.constant 0 : index
    %14 = vector.load %arg5[%c0_10, %c0_11, %c0_12] : memref<1x4x32xf32, #tpu.memory_space<vmem>>, vector<1x4x32xf32>
    %15 = vector.shape_cast %14 : vector<1x4x32xf32> to vector<4x32xf32>
    %16 = vector.shape_cast %13 : vector<4x32xf32> to vector<1x4x32xf32>
    tpu.vector_store %arg5[%c0_10, %c0_11, %c0_12], %16 {strides = array<i32>} : memref<1x4x32xf32, #tpu.memory_space<vmem>>, vector<1x4x32xf32>,
    %c0_13 = arith.constant 0 : index
    %c0_14 = arith.constant 0 : index
    %c0_15 = arith.constant 0 : index
    %17 = vector.load %arg6[%c0_13, %c0_14, %c0_15] : memref<1x4x32xf32, #tpu.memory_space<vmem>>, vector<1x4x32xf32>
    %18 = vector.shape_cast %17 : vector<1x4x32xf32> to vector<4x32xf32>
    %c0_16 = arith.constant 0 : index
    %c0_17 = arith.constant 0 : index
    %c0_18 = arith.constant 0 : index
    %19 = vector.load %arg3[%c0_16, %c0_17, %c0_18] : memref<1x32x256xf32, #tpu.memory_space<vmem>>, vector<1x32x256xf32>
    %20 = vector.shape_cast %19 : vector<1x32x256xf32> to vector<32x256xf32>
    %21 = arith.mulf %20, %9 : vector<32x256xf32>
    %cst_19 = arith.constant dense<0.000000e+00> : vector<4x32xf32>
    %22 = tpu.matmul %5, %21, %cst_19 {dimension_numbers = #tpu.dot_dimension_numbers<[1], [1], [0], [0], [0, 0, 1, 0], [], []>} : vector<4x256xf32>, vector<32x256xf32>, vector<4x32xf32> -> vector<4x32xf32>
    %23 = arith.addf %18, %22 : vector<4x32xf32>
    %c0_20 = arith.constant 0 : index
    %c0_21 = arith.constant 0 : index
    %c0_22 = arith.constant 0 : index
    %24 = vector.load %arg6[%c0_20, %c0_21, %c0_22] : memref<1x4x32xf32, #tpu.memory_space<vmem>>, vector<1x4x32xf32>
    %25 = vector.shape_cast %24 : vector<1x4x32xf32> to vector<4x32xf32>
    %26 = vector.shape_cast %23 : vector<4x32xf32> to vector<1x4x32xf32>
    tpu.vector_store %arg6[%c0_20, %c0_21, %c0_22], %26 {strides = array<i32>} : memref<1x4x32xf32, #tpu.memory_space<vmem>>, vector<1x4x32xf32>,
    return
  }
  func.func @transform_0(%arg0: i32, %arg1: i32) -> (i32, i32, i32) {
    %c0_i32 = arith.constant 0 : i32
    %c0_i32_0 = arith.constant 0 : i32
    return %arg0, %c0_i32, %arg1 : i32, i32, i32
  }
  func.func @transform_1(%arg0: i32, %arg1: i32) -> (i32, i32, i32) {
    %c0_i32 = arith.constant 0 : i32
    %c0_i32_0 = arith.constant 0 : i32
    return %arg0, %c0_i32, %arg1 : i32, i32, i32
  }
  func.func @transform_2(%arg0: i32, %arg1: i32) -> (i32, i32, i32) {
    %c0_i32 = arith.constant 0 : i32
    %c0_i32_0 = arith.constant 0 : i32
    return %arg0, %c0_i32, %arg1 : i32, i32, i32
  }
  func.func @transform_3(%arg0: i32, %arg1: i32) -> (i32, i32, i32) {
    %c0_i32 = arith.constant 0 : i32
    %c0_i32_0 = arith.constant 0 : i32
    %c0_i32_1 = arith.constant 0 : i32
    return %arg0, %c0_i32, %c0_i32_0 : i32, i32, i32
  }
  func.func @transform_4(%arg0: i32, %arg1: i32) -> (i32, i32, i32) {
    %c0_i32 = arith.constant 0 : i32
    %c0_i32_0 = arith.constant 0 : i32
    %c0_i32_1 = arith.constant 0 : i32
    return %arg0, %c0_i32, %c0_i32_0 : i32, i32, i32
  }
}

</mosaic_0001>

<bundles_post_ra>
// kernel: tpu_custom_call.1
= control target key start
LH: loop header
LB: loop body
LE: loop exit
PB: predicated region body
PF: predicated region fallthrough
CT: control target
= control target key end

     0   :  { %s1428_s0 = inlined_call_operand.hbm [shape: bf16[2,4,256], index: 0, kind: input, shape index: {}]   ;;  %s1429_s1 = inlined_call_operand.hbm [shape: f32[2,32,256], index: 1, kind: input, shape index: {}]   ;;  %s1430_s2 = inlined_call_operand.hbm [shape: f32[2,32,256], index: 2, kind: input, shape index: {}]   ;;  %s1431_s3 = inlined_call_operand.hbm [shape: f32[2,4,32], index: 3, kind: output, shape index: {0}]   ;;  %s1432_s4 = inlined_call_operand.hbm [shape: f32[2,4,32], index: 4, kind: output, shape index: {1}]  }
   0x1   :  { %1442 = sst [smem:[#allocation19_spill]] %s1429_s1 }
   0x2   :  { %10 = vsyncpa [#allocation3], 0 }
   0x3   :  { %12 = vsyncpa [#allocation3 + $0x1], 0 }
   0x4   :  { %13 = vsyncpa [#allocation6], 0 }
   0x5   :  { %15 = vsyncpa [#allocation6 + $0x1], 0 }
   0x6   :  { %16 = vsyncpa [#allocation4], 0 }
   0x7   :  { %18 = vsyncpa [#allocation4 + $0x1], 0 }
   0x8   :  { %19 = vsyncpa [#allocation10], 0 }
   0x9   :  { %21 = vsyncpa [#allocation10 + $0x1], 0  ;;  %s1105_s15 = smov 0   ;;  %s1107_s16 = smov 0  }
   0xa   :  { %s1109_s17 = smov 0   ;;  %s1111_s18 = smov 0  }
   0xb   :  { %s1113_s19 = smov 0   ;;  %s1115_s20 = smov 0  }
   0xc LB: > { %1443 = sst [smem:[#allocation15_spill]] %s1058_s17  ;;  %s1136_s21 = sadd.s32 4294967295, %s1070_s20   ;;  %s1070_s20 = sphi %s1115_s20, %s27_s20   ;;  %s1066_s19 = sphi %s1113_s19, %s1470_s19   ;;  %s1062_s18 = sphi %s1111_s18, %s1469_s18   ;;  %s1058_s17 = sphi %s1109_s17, %s1465_s17   ;;  %s1054_s16 = sphi %s1107_s16, %s1468_s16   ;;  %s1050_s15 = sphi %s1105_s15, %s1467_s15  }
   0xd   : > { %s723_s22 = sadd.s32 4294967294, %s1070_s20   ;;  %s39_s23 = sadd.s32 1, %s1066_s19 }
   0xe   : > { %s48_s24 = sadd.s32 1, %s1058_s17  ;;  %p41_p0 = scmp.ge.s32.totalorder %s39_s23, 2 }
   0xf   : > { %p55_p1 = scmp.ne.s32.totalorder %s1058_s17, %s1054_s16  ;;  %p56_p2 = scmp.eq.s32.totalorder %s1070_s20, 0 }
  0x10   : > { %p61_p3 = scmp.ne.s32.totalorder %s1054_s16, %s1050_s15  ;;  %s1472_s23 = smov (%p41_p0, %s39_s23), 0 }
  0x11   : > { %1444 = sst [smem:[#allocation16_spill]] %s1472_s23  ;;  %p1148_p4 = por %p56_p2, %p55_p1 }
  0x12   : > { %p62_p5 = scmp.eq.s32.totalorder %s1136_s21, 0  ;;  %s43_s26 = ssub.s32 %s1066_s19, %s1472_s23 }
  0x13   : > { %p141_p6 = scmp.eq.s32.totalorder %s1136_s21, 1  ;;  %p46_p7 = scmp.eq.s32.totalorder %s43_s26, 0 }
  0x14   : > { %p1156_p8 = por %p62_p5, %p61_p3  ;;  %p147_p10 = scmp.eq.s32.totalorder %s723_s22, 1 }
  0x15   : > { %p1160_p9 = por %p141_p6, %p55_p1  ;;  %p793_p13 = scmp.lt.s32.totalorder %s1070_s20, 2 }
  0x16   : > { %s1446_s27 = scalar_select %p1156_p8, 1, 0 }
  0x17   : > { %s1447_s28 = scalar_select %p1160_p9, 1, 0 }
  0x18   : > { %s1165_s29 = scalar_select %p46_p7, %s1058_s17, %s48_s24  }
  0x19   : > { %p1167_p11 = por %p147_p10, %p61_p3  ;;  %s1174_s5 = sand.u32 1, %s1058_s17  }
  0x1a   : > { %1448 = sst [smem:[#allocation17_spill]] %s1165_s29  ;;  %s214_s6 = sand.u32 1, %s1070_s20  }
  0x1b   : > { %s1449_s30 = scalar_select %p1167_p11, 1, 0 }
  0x1c   : > { %s1433_s7 = sshll.u32 %s1174_s5, 6  ;;  %p1180_p0 = pnand %p793_p13, %p1148_p4 }
  0x1d   : > { %1450 = sst [smem:[#allocation18_spill]] %s1449_s30  ;;  %s748_s9 = sshll.u32 %s1066_s19, 10 }
  0x1e   : > { %s1451_s8 = scalar_select %p1180_p0, 1, 0 }
  0x1f   : > { %s1452_s1 = sld [smem:[#allocation19_spill]]  ;;  %s218_s13 = scalar_lea.vmem [#allocation5], %s1433_s7 }
  0x20   : > { %s227_s14 = sshll.u32 %s218_s13, 4  ;;  %s1196_s22 = scalar_lea.sflag [#allocation6], %s214_s6  ;;  %s1194_s14 = int_to_ptr.vmem [resolvable:$true] %s227_s14 }
  0x21   : > { %p1202_p2 = pneg %p1180_p0 }
  0x25   : > { %s1190_s12 = scalar_lea.hbm %s1452_s1, %s748_s9  ;;  %s867_s11 = scalar_lea.hbm %s1452_s1, 2048 }
  0x26   : > { %s862_s24 = scalar_lea.hbm %s1190_s12, 1024  ;;  %p868_p5 = scmp.lt.u32.totalorder %s1190_s12, %s1452_s1 }
  0x27   : > { %p863_p1 = scmp.ne.s32.totalorder %s1190_s12, %s862_s24  ;;  %p869_p6 = scmp.lt.u32.totalorder %s867_s11, %s862_s24 }
  0x28   : > { %p871_p10 = scmp.lt.u32.totalorder %s862_s24, %s1190_s12 }
  0x29   : > { %p865_p3 = pnand %p1202_p2, %p863_p1  ;;  %p870_p7 = por %p869_p6, %p868_p5 }
  0x2b   : > { %p866_p4 = pneg %p865_p3  ;;  %p872_p13 = por %p871_p10, %p870_p7 }
  0x2d   : > { %p873_p12 = pnand %p872_p13, %p866_p4 }
  0x2f   : > { %876 = shalt.err (!%p873_p12)
}
  0x30   : > { %s877_s6 = scalar_lea.vmem %s1194_s14, 1024  ;;  %s1072_s26 = smov [#allocation5]  }
  0x31   : > { %p878_p1 = scmp.ne.s32.totalorder %s1194_s14, %s877_s6  ;;  %s882_s10 = sshll.u32 %s1072_s26, 4  ;;  %s883_s10 = int_to_ptr.vmem [resolvable:$false] %s882_s10 }
  0x32   : > { %s884_s7 = scalar_lea.vmem %s883_s10, 2048  ;;  %p885_p9 = scmp.lt.s32.totalorder %s1194_s14, %s883_s10 }
  0x33   : > { %p880_p3 = pnand %p878_p1, %p1202_p2  ;;  %p886_p8 = scmp.lt.s32.totalorder %s884_s7, %s877_s6 }
  0x35   : > { %p881_p11 = pneg %p880_p3  ;;  %p887_p5 = por %p886_p8, %p885_p9 }
  0x37   : > { %p888_p6 = pnand %p887_p5, %p881_p11 }
  0x39   : > { %891 = shalt.err (!%p888_p6)
}
  0x3a   : > { %s1439_s24 = smov 256   ;;  %s1074_s11 = smov 16  }
  0x3b   : > { %782 = dma.hbm_to_vmem [thread:$0]  (!%p1180_p0), %s1190_s12, 1024, %s1194_s14, %s1196_s22, %s1439_s24, %s1439_s24, %s1074_s11  }
  0x3c   : > { %s1234_s26 = scalar_lea.hbm %s1430_s2, %s748_s9  ;;  %p735_p8 = scmp.ge.s32.totalorder %s1070_s20, 1 }
  0x3d   : > { %s1454_s10 = sshll.u32 %s1174_s5, 6  ;;  %p258_p9 = scmp.lt.s32.totalorder %s1070_s20, 3 }
  0x3e   : > { %s241_s7 = scalar_lea.vmem [#allocation7], %s1454_s10  ;;  %s726_s29 = sshll.u32 %s1174_s5, 2 }
  0x3f   : > { %s250_s1 = sshll.u32 %s241_s7, 4  ;;  %p1240_p11 = pnand %p735_p8, %p258_p9  ;;  %s1251_s1 = int_to_ptr.vmem [resolvable:$true] %s250_s1 }
  0x40   : > { %s747_s17 = sshll.u32 %s1066_s19, 6  ;;  %s197_s9 = scalar_lea.vmem [#allocation2], %s726_s29 }
  0x41   : > { %s1455_s23 = scalar_select %p1240_p11, 1, 0 }
  0x42   : > { %s1249_s14 = scalar_lea.hbm %s1428_s0, %s747_s17  ;;  %s207_s13 = sshll.u32 %s197_s9, 4  ;;  %s208_s13 = int_to_ptr.vmem [resolvable:$true] %s207_s13 }
  0x43   : > { %s194_s6 = scalar_lea.sflag [#allocation3], %s1174_s5  ;;  %s892_s10 = scalar_lea.hbm %s1249_s14, 64 }
  0x44   : > { %p893_p12 = scmp.ne.s32.totalorder %s1249_s14, %s892_s10  ;;  %s897_s17 = scalar_lea.hbm %s1428_s0, 128 }
  0x45   : > { %p898_p10 = scmp.lt.u32.totalorder %s1249_s14, %s1428_s0  ;;  %p899_p13 = scmp.lt.u32.totalorder %s897_s17, %s892_s10 }
  0x46   : > { %p895_p4 = pnand %p893_p12, %p1202_p2  ;;  %p901_p3 = scmp.lt.u32.totalorder %s892_s10, %s1249_s14 }
  0x47   : > { %p900_p1 = por %p899_p13, %p898_p10 }
  0x48   : > { %p896_p7 = pneg %p895_p4 }
  0x49   : > { %p902_p5 = por %p901_p3, %p900_p1 }
  0x4b   : > { %p903_p6 = pnand %p902_p5, %p896_p7 }
  0x4d   : > { %906 = shalt.err (!%p903_p6)
}
  0x4e   : > { %s907_s29 = scalar_lea.vmem %s208_s13, 64  ;;  %s1075_s5 = smov [#allocation2]  }
  0x4f   : > { %p908_p8 = scmp.ne.s32.totalorder %s208_s13, %s907_s29  ;;  %s912_s9 = sshll.u32 %s1075_s5, 4  ;;  %s913_s9 = int_to_ptr.vmem [resolvable:$false] %s912_s9 }
  0x50   : > { %s914_s24 = scalar_lea.vmem %s913_s9, 128  ;;  %p915_p4 = scmp.lt.s32.totalorder %s208_s13, %s913_s9 }
  0x51   : > { %p910_p9 = pnand %p908_p8, %p1202_p2  ;;  %p916_p11 = scmp.lt.s32.totalorder %s914_s24, %s907_s29 }
  0x53   : > { %p911_p12 = pneg %p910_p9  ;;  %p917_p0 = por %p916_p11, %p915_p4 }
  0x55   : > { %p918_p10 = pnand %p917_p0, %p911_p12 }
  0x57   : > { %921 = shalt.err (!%p918_p10)
}
  0x58   : > { %p1456_p13 = scmp.ne.s32.totalorder %s1451_s8, 0  ;;  %s922_s10 = scalar_lea.hbm %s1234_s26, 1024 }
  0x59   : > { %p923_p7 = scmp.ne.s32.totalorder %s1234_s26, %s922_s10  ;;  %s927_s30 = scalar_lea.hbm %s1430_s2, 2048 }
  0x5a   : > { %779 = dma.hbm_to_vmem [thread:$0]  (!%p1456_p13), %s1249_s14, 64, %s208_s13, %s194_s6  }
  0x5b   : > { %p925_p1 = pnand %p923_p7, %p1202_p2  ;;  %p928_p0 = scmp.lt.u32.totalorder %s1234_s26, %s1430_s2 }
  0x5c   : > { %p929_p11 = scmp.lt.u32.totalorder %s927_s30, %s922_s10  ;;  %p931_p6 = scmp.lt.u32.totalorder %s922_s10, %s1234_s26 }
  0x5d   : > { %p926_p3 = pneg %p925_p1 }
  0x5e   : > { %p930_p5 = por %p929_p11, %p928_p0 }
  0x60   : > { %p932_p8 = por %p931_p6, %p930_p5 }
  0x62   : > { %p933_p9 = pnand %p932_p8, %p926_p3 }
  0x64   : > { %936 = shalt.err (!%p933_p9)
}
  0x65   : > { %s937_s14 = scalar_lea.vmem %s1251_s1, 1024  ;;  %s1076_s13 = smov [#allocation7]  }
  0x66   : > { %p938_p12 = scmp.ne.s32.totalorder %s1251_s1, %s937_s14  ;;  %s942_s6 = sshll.u32 %s1076_s13, 4  ;;  %s943_s6 = int_to_ptr.vmem [resolvable:$false] %s942_s6 }
  0x67   : > { %s944_s5 = scalar_lea.vmem %s943_s6, 2048  ;;  %p945_p7 = scmp.lt.s32.totalorder %s1251_s1, %s943_s6 }
  0x68   : > { %p940_p4 = pnand %p938_p12, %p1202_p2  ;;  %p946_p1 = scmp.lt.s32.totalorder %s944_s5, %s937_s14 }
  0x6a   : > { %p941_p10 = pneg %p940_p4  ;;  %p947_p0 = por %p946_p1, %p945_p7 }
  0x6c   : > { %p948_p11 = pnand %p947_p0, %p941_p10 }
  0x6e   : > { %951 = shalt.err (!%p948_p11)
}
  0x6f   : > { %s1457_s9 = smov 256   ;;  %p1458_p2 = scmp.ne.s32.totalorder %s1455_s23, 0 }
  0x70   : > { %785 = dma.hbm_to_vmem [thread:$0]  (!%p1456_p13), %s1234_s26, 1024, %s1251_s1, %s1196_s22, %s1457_s9, %s1457_s9, %s1074_s11  }
  0x71   : > { %262 = sbr.rel (%p1458_p2) target bundleno = 408 (0x198), region = 32  ;;  %s1299_s25 = sand.u32 (!%p1458_p2), 1, %s1054_s16  }
  0x72   : > { %s1302_s24 = sshll.u32 (!%p1458_p2), %s1299_s25, 2  ;;  %s265_s8 = scalar_lea.sflag (!%p1458_p2), [#allocation3], %s1299_s25 }
  0x73   : > { %s268_s10 = scalar_lea.vmem (!%p1458_p2), [#allocation2], %s1302_s24  ;;  %p1459_p3 = scmp.ne.s32.totalorder (!%p1458_p2), %s1446_s27, 0 }
  0x78   : > { %1033 = dma.done.wait (%p1459_p3), %s265_s8, 64  }
  0x79   : > { %1035 = vsyncadd (%p1459_p3), %s265_s8, 4294967232  ;;  %s273_s1 = sand.u32 1, %s1136_s21   ;;  %s737_s23 = sshll.u32 %s1299_s25, 6 }
  0x7a   : > { %s274_s22 = scalar_lea.sflag [#allocation6], %s273_s1  ;;  %s1312_s11 = scalar_lea.vmem [#allocation5], %s737_s23 }
  0x7b   : > { %1037 = dma.done.wait (%p1459_p3), %s274_s22, 2048  }
  0x7c   : > { %1039 = vsyncadd (%p1459_p3), %s274_s22, 4294965248  ;;  %vm333_vm0 = vcmask 257024   ;;  %s1319_s26 = scalar_lea.vmem [#allocation8], %s1302_s24  ;;  %v1077_v0 = vmov 0.0   ;;  %s286_s7 = scalar_lea.vmem [#allocation7], %s737_s23  ;;  %v441_v12 = vld [vmem:[%s1312_s11 + $0x8] sm:$0xff] }
  0x7d   : > { %334 = vst.msk [vmem:[%s1319_s26] sm:$0xf] %vm333_vm0, %v1077_v0  ;;  %v339_v1 = vld [vmem:[%s286_s7 + $0x8] sm:$0xff]  ;;  %v341_v2 = vld [vmem:[%s286_s7 + $0x18] sm:$0xff]  ;;  %v338_v3 = vld [vmem:[%s286_s7] sm:$0xff]  ;;  %s1333_s21 = scalar_lea.vmem [#allocation9], %s1302_s24 }
  0x7e   : > { %846 = vrcp.f32 %v339_v1  ;;  %v340_v4 = vld [vmem:[%s286_s7 + $0x10] sm:$0xff]  ;;  %v343_v5 = vld [vmem:[%s286_s7 + $0x28] sm:$0xff]  ;;  %v345_v6 = vld [vmem:[%s286_s7 + $0x38] sm:$0xff]  ;;  %335 = vst.msk [vmem:[%s1333_s21] sm:$0xf] %vm333_vm0, %v1077_v0  ;;  %s743_s27 = sshll.u32 %s1062_s18, 6 }
  0x7f   : > { %848 = vrcp.f32 %v341_v2  ;;  %v342_v7 = vld [vmem:[%s286_s7 + $0x20] sm:$0xff]  ;;  %v344_v8 = vld [vmem:[%s286_s7 + $0x30] sm:$0xff]  ;;  %v336_v9 = vld [vmem:[%s268_s10] sm:$0xf]  ;;  %s547_s17 = sshll.u32 %s1319_s26, 4  ;;  %s560_s30 = sshll.u32 %s1333_s21, 4  ;;  %s1348_s17 = int_to_ptr.vmem [resolvable:$true] %s547_s17  ;;  %s1357_s30 = int_to_ptr.vmem [resolvable:$true] %s560_s30 }
  0x80   : > { %850 = vrcp.f32 %v338_v3  ;;  %v337_v10 = vunpack.c.l.bf16 %v336_v9  ;;  %v443_v13 = vld [vmem:[%s1312_s11 + $0x18] sm:$0xff]  ;;  %v440_v15 = vld [vmem:[%s1312_s11] sm:$0xff]  ;;  %v442_v18 = vld [vmem:[%s1312_s11 + $0x10] sm:$0xff]  ;;  %s1346_s14 = scalar_lea.hbm %s1431_s3, %s743_s27  ;;  %s1355_s6 = scalar_lea.hbm %s1432_s4, %s743_s27 }
  0x81   : > { %852 = vrcp.f32 %v340_v4  ;;  %v445_v22 = vld [vmem:[%s1312_s11 + $0x28] sm:$0xff]  ;;  %v447_v25 = vld [vmem:[%s1312_s11 + $0x38] sm:$0xff]  ;;  %v444_v32 = vld [vmem:[%s1312_s11 + $0x20] sm:$0xff]  ;;  %s529_s5 = scalar_lea.sflag [#allocation4], %s1299_s25  ;;  %s952_s9 = scalar_lea.vmem %s1348_s17, 64 }
  0x82   : > { %854 = vrcp.f32 %v343_v5  ;;  %v364_v11 = vcombine.high %v337_v10, %v337_v10  ;;  %v446_v33 = vld [vmem:[%s1312_s11 + $0x30] sm:$0xff]  ;;  %p953_p13 = scmp.ne.s32.totalorder %s1348_s17, %s952_s9  ;;  %p1460_p5 = scmp.ne.s32.totalorder %s1447_s28, 0 }
  0x83   : > { %856 = vrcp.f32 %v345_v6  ;;  %s1078_s24 = smov [#allocation8]  }
  0x84   : > { %858 = vrcp.f32 %v342_v7  ;;  %430 = vmatprep.mubr.f32.mxu0 %v364_v11  ;;  %520 = vmatprep.mubr.f32.mxu1 %v364_v11  ;;  %v362_v44 = vld [vmem:[%s1319_s26] sm:$0xf]  ;;  %p954_p6 = pnand %p953_p13, %p1460_p5  ;;  %s956_s8 = sshll.u32 %s1078_s24, 4  ;;  %s957_s8 = int_to_ptr.vmem [resolvable:$false] %s956_s8 }
  0x85   : > { %860 = vrcp.f32 %v344_v8  ;;  %v439_v46 = vld [vmem:[%s1333_s21] sm:$0xf]  ;;  %s958_s10 = scalar_lea.vmem %s957_s8, 128  ;;  %p959_p9 = scmp.lt.s32.totalorder %s1348_s17, %s957_s8 }
  0x86   : > { %p955_p8 = pneg %p954_p6  ;;  %p960_p12 = scmp.lt.s32.totalorder %s958_s10, %s952_s9 }
  0x88   : > { %v847_v14 = vpop.eup %846  ;;  %p961_p4 = por %p960_p12, %p959_p9 }
  0x89   : > { %v849_v16 = vpop.eup %848  ;;  %v449_v17 = vmul.f32 %v847_v14, %v441_v12 }
  0x8a   : > { %v851_v19 = vpop.eup %850  ;;  %v750_v20 = vpack.c.bf16 %v849_v16, %v847_v14  ;;  %v451_v21 = vmul.f32 %v849_v16, %v443_v13  ;;  %p962_p10 = pnand %p961_p4, %p955_p8 }
  0x8b   : > { %v853_v23 = vpop.eup %852  ;;  %v448_v24 = vmul.f32 %v851_v19, %v440_v15 }
  0x8c   : > { %v855_v26 = vpop.eup %854  ;;  %751 = vmatprep.subr.bf16.mxu0 %v750_v20  ;;  %v752_v27 = vpack.c.bf16 %v853_v23, %v851_v19  ;;  %v758_v28 = vpack.c.bf16 %v451_v21, %v449_v17  ;;  %v450_v29 = vmul.f32 %v853_v23, %v442_v18 }
  0x8d   : > { %v857_v30 = vpop.eup %856  ;;  %v453_v31 = vmul.f32 %v855_v26, %v445_v22 }
  0x8e   : > { %v859_v34 = vpop.eup %858  ;;  %753 = vmatpush1.bf16.xpose.msra.mxu0 %v752_v27  ;;  %759 = vmatprep.subr.bf16.mxu1 %v758_v28  ;;  %v760_v35 = vpack.c.bf16 %v450_v29, %v448_v24  ;;  %v754_v36 = vpack.c.bf16 %v857_v30, %v855_v26  ;;  %v455_v37 = vmul.f32 %v857_v30, %v447_v25 }
  0x8f   : > { %v861_v38 = vpop.eup %860  ;;  %v452_v40 = vmul.f32 %v859_v34, %v444_v32 }
  0x90   : > { %761 = vmatpush1.bf16.xpose.msra.mxu1 %v760_v35  ;;  %755 = vmatprep.subr.bf16.mxu0 %v754_v36  ;;  %v762_v39 = vpack.c.bf16 %v455_v37, %v453_v31  ;;  %v454_v41 = vmul.f32 %v861_v38, %v446_v33  ;;  %v756_v42 = vpack.c.bf16 %v861_v38, %v859_v34 }
  0x92   : > { %763 = vmatprep.subr.bf16.mxu1 %v762_v39  ;;  %v764_v43 = vpack.c.bf16 %v454_v41, %v452_v40 }
  0x96   : > { %757 = vmatpush1.bf16.xpose.msra.mxu0 %v756_v42 }
  0x98   : > { %765 = vmatpush1.bf16.xpose.msra.mxu1 %v764_v43 }
  0x9d   : > { %431 = vmatmul.mubr.f32.vlgmr.msra.gmra.mrb[0].mxu0 %v337_v10 }
  0x9f   : > { %521 = vmatmul.mubr.f32.vlgmr.msra.gmra.mrb[0].mxu1 %v337_v10 }
 0x170   : > { %v432_v45 = vpop.f32.mrb[0].mxu0 }
 0x171   : > { %v436_v47 = vadd.f32 %v432_v45, %v362_v44  ;;  %v434_v48 = vpop.f32.mrb[1].mxu0 }
 0x172   : > { %v522_v49 = vpop.f32.mrb[0].mxu1 }
 0x173   : > { %438 = vst.msk [vmem:[%s1319_s26] sm:$0xf] %vm333_vm0, %v436_v47  ;;  %v526_v50 = vadd.f32 %v522_v49, %v439_v46  ;;  %v524_v51 = vpop.f32.mrb[1].mxu1 }
 0x174   : > { %965 = shalt.err (!%p962_p10)
}
 0x175   : > { %s966_s1 = scalar_lea.hbm %s1346_s14, 64  ;;  %s970_s11 = scalar_lea.hbm %s1431_s3, 128 }
 0x176   : > { %p967_p7 = scmp.ne.s32.totalorder %s1346_s14, %s966_s1  ;;  %p971_p11 = scmp.lt.u32.totalorder %s1346_s14, %s1431_s3 }
 0x177   : > { %p972_p2 = scmp.lt.u32.totalorder %s970_s11, %s966_s1  ;;  %p974_p13 = scmp.lt.u32.totalorder %s966_s1, %s1346_s14 }
 0x178   : > { %p968_p1 = pnand %p967_p7, %p1460_p5 }
 0x179   : > { %p973_p3 = por %p972_p2, %p971_p11 }
 0x17a   : > { %p969_p0 = pneg %p968_p1 }
 0x17b   : > { %p975_p6 = por %p974_p13, %p973_p3 }
 0x17d   : > { %p976_p8 = pnand %p975_p6, %p969_p0 }
 0x17f   : > { %979 = shalt.err (!%p976_p8)
}
 0x180   : > { %772 = dma.vmem_to_hbm [thread:$0]  (%p1460_p5), %s1348_s17, 64, %s1346_s14, %s529_s5   ;;  %527 = vst.msk [vmem:[%s1333_s21] sm:$0xf] %vm333_vm0, %v526_v50 }
 0x181   : > { %s534_s27 = scalar_lea.sflag [#allocation10], %s1299_s25  ;;  %s980_s12 = scalar_lea.vmem %s1357_s30, 64 }
 0x182   : > { %p981_p9 = scmp.ne.s32.totalorder %s1357_s30, %s980_s12  ;;  %s1079_s29 = smov [#allocation9]  }
 0x183   : > { %s984_s18 = sshll.u32 %s1079_s29, 4  ;;  %s985_s18 = int_to_ptr.vmem [resolvable:$false] %s984_s18 }
 0x184   : > { %p982_p12 = pnand %p981_p9, %p1460_p5  ;;  %s986_s13 = scalar_lea.vmem %s985_s18, 128 }
 0x185   : > { %p987_p10 = scmp.lt.s32.totalorder %s1357_s30, %s985_s18  ;;  %p988_p7 = scmp.lt.s32.totalorder %s986_s13, %s980_s12 }
 0x186   : > { %p983_p4 = pneg %p982_p12 }
 0x187   : > { %p989_p1 = por %p988_p7, %p987_p10 }
 0x189   : > { %p990_p0 = pnand %p989_p1, %p983_p4 }
 0x18b   : > { %993 = shalt.err (!%p990_p0)
}
 0x18c   : > { %s994_s25 = scalar_lea.hbm %s1355_s6, 64  ;;  %s998_s14 = scalar_lea.hbm %s1432_s4, 128 }
 0x18d   : > { %p995_p11 = scmp.ne.s32.totalorder %s1355_s6, %s994_s25  ;;  %p999_p13 = scmp.lt.u32.totalorder %s1355_s6, %s1432_s4 }
 0x18e   : > { %p1000_p6 = scmp.lt.u32.totalorder %s998_s14, %s994_s25  ;;  %p1002_p9 = scmp.lt.u32.totalorder %s994_s25, %s1355_s6 }
 0x18f   : > { %p996_p2 = pnand %p995_p11, %p1460_p5 }
 0x190   : > { %p1001_p8 = por %p1000_p6, %p999_p13 }
 0x191   : > { %p997_p3 = pneg %p996_p2 }
 0x192   : > { %p1003_p12 = por %p1002_p9, %p1001_p8 }
 0x194   : > { %p1004_p4 = pnand %p1003_p12, %p997_p3 }
 0x196   : > { %1007 = shalt.err (!%p1004_p4)
}
 0x197   : > { %773 = dma.vmem_to_hbm [thread:$0]  (%p1460_p5), %s1357_s30, 64, %s1355_s6, %s534_s27  }
 0x198 PF: > { %s1461_s24 = sld [smem:[#allocation18_spill]]  ;;  %s572_s8 = sand.u32 1, %s1050_s15  }
 0x199   : > { %p1463_p7 = scmp.ge.s32.totalorder %s1070_s20, 2  ;;  %s573_s10 = scalar_lea.sflag [#allocation4], %s572_s8 }
 0x19e   : > { %p1462_p10 = scmp.ne.s32.totalorder %s1461_s24, 0 }
 0x1a0   : > { %p787_p1 = pnand %p1463_p7, %p1462_p10 }
 0x1a2   : > { %1041 = dma.done.wait (!%p787_p1), %s573_s10, 64  }
 0x1a3   : > { %1043 = vsyncadd (!%p787_p1), %s573_s10, 4294967232  ;;  %s582_s1 = scalar_lea.sflag [#allocation10], %s572_s8 }
 0x1a4   : > { %1045 = dma.done.wait (!%p787_p1), %s582_s1, 64  }
 0x1a5   : > { %1047 = vsyncadd (!%p787_p1), %s582_s1, 4294967232  ;;  %s27_s20 = sadd.s32 1, %s1070_s20   ;;  %s1464_s28 = sld [smem:[#allocation15_spill]] }
 0x1a6   : > { %p24_p0 = scmp.ge.s32.totalorder %s27_s20, 4   ;;  %s1465_s17 = sld [smem:[#allocation17_spill]] }
 0x1a7   : > { %s1466_s30 = sld [smem:[#allocation16_spill]]  ;;  %s1467_s15 = smov %s1054_s16 }
 0x1a8   : > { %s1469_s18 = smov %s1066_s19  ;;  %26 = sbr.rel (!%p24_p0) target bundleno = 12 (0xc), region = 122 }
 0x1ab   : > { %s1468_s16 = smov %s1464_s28 }
 0x1ad   : > { %s1470_s19 = smov %s1466_s30 }
 0x1af   :  { %587 = vsyncpa [#allocation3], 1 }
 0x1b0   :  { %589 = vsyncpa [#allocation3 + $0x1], 1 }
 0x1b1   :  { %590 = vsyncpa [#allocation6], 1 }
 0x1b2   :  { %592 = vsyncpa [#allocation6 + $0x1], 1 }
 0x1b3   :  { %593 = vsyncpa [#allocation4], 1 }
 0x1b4   :  { %595 = vsyncpa [#allocation4 + $0x1], 1 }
 0x1b5   :  { %596 = vsyncpa [#allocation10], 1 }
 0x1b6   :  { %598 = vsyncpa [#allocation10 + $0x1], 1 }

</bundles_post_ra>
